<compile_context>
chip_gen: v7x
topology: tpu7x:2x2x1
jax: 0.10.0
libtpu: 0.0.40
codegen_flags: <defaults>
</compile_context>

<pallas_src>
import functools

import jax
import jax.numpy as jnp
from jax import lax
from jax.experimental import pallas as pl
from jax.experimental.pallas import tpu as pltpu

ALPHA = 0.25
GAMMA = 2.0

LANES = 128      # lane width (last-dim tile)
CHUNK = 64       # rows per inner-loop step (8 f32 vregs per array)
TM_MAX = 2048    # max rows per tile: 2048*128*4B = 1 MiB per f32 input block


def _cdiv(a, b):
    return -(-a // b)


def _round_up(a, b):
    return _cdiv(a, b) * b


def _sublane_multiple(*dtypes):
    """Second-to-last block-dim multiple required by the narrowest dtype."""
    need = 8
    for dt in dtypes:
        need = max(need, {4: 8, 2: 16, 1: 32}.get(jnp.dtype(dt).itemsize, 8))
    return need


def _focal_kernel(x_ref, t_ref, o_ref, acc_ref, *,
                  n_valid, tm, n_inner, chunk, has_tail):
    """Per-tile focal-loss partial sums into an (8, 128) accumulator."""
    p = pl.program_id(0)   # parallel stripe (separate TensorCore on v7x)
    i = pl.program_id(1)   # reduction step within the stripe

    @pl.when(i == 0)
    def _init():
        acc_ref[...] = jnp.zeros_like(acc_ref)

    # Unclamped global element offset of this tile.  Used to detect the ragged
    # tail and the <= P-1 overhang grid steps; the DMA itself is kept in-bounds
    # by the clamped index_map in the wrapper.
    elem0 = (p * n_inner + i) * (tm * LANES)
    remaining = n_valid - elem0            # valid elements from tile start

    def accum(r0, rows, limit):
        """Accumulate the focal loss of rows [r0, r0+rows) of this tile."""
        x = x_ref[pl.ds(r0, rows), :].astype(jnp.float32)
        t = t_ref[pl.ds(r0, rows), :].astype(jnp.float32)
        # Numerically stable BCE-with-logits (torch formulation):
        #   bce = max(x, 0) - x*t + log1p(exp(-|x|))
        e = jnp.exp(-jnp.abs(x))
        bce = jnp.maximum(x, 0.0) - x * t + jnp.log1p(e)
        u = 1.0 - jnp.exp(-bce)            # 1 - pt
        if GAMMA == 2.0:
            w = u * u                      # gamma == 2 -> plain square, no pow
        else:
            w = u ** GAMMA
        fl = bce * w                       # alpha & 1/N folded in by wrapper
        if limit is not None:
            # Ragged tail: zero contributions past the true element count.
            rid = lax.broadcasted_iota(jnp.int32, (rows, LANES), 0)
            cid = lax.broadcasted_iota(jnp.int32, (rows, LANES), 1)
            fl = jnp.where((r0 + rid) * LANES + cid < limit, fl, 0.0)
        # Fold onto the (8, 128) vreg-shaped accumulator with pure VPU adds.
        acc_ref[...] += jnp.sum(fl.reshape(rows // 8, 8, LANES), axis=0)

    n_full = tm // chunk
    rem = tm - n_full * chunk              # static; multiple of 8 when nonzero

    def run(limit):
        def body(c, carry):
            r0 = pl.multiple_of(c * chunk, chunk)
            accum(r0, chunk, limit)
            return carry
        lax.fori_loop(0, n_full, body, 0, unroll=(n_full <= 8))
        if rem:
            accum(n_full * chunk, rem, limit)

    if has_tail:
        @pl.when(remaining >= tm * LANES)          # fully valid: mask-free path
        def _full():
            run(None)

        @pl.when((remaining > 0) & (remaining < tm * LANES))   # ragged tail
        def _tail():
            run(remaining)
        # remaining <= 0: overhang grid step -> contributes nothing.
    else:
        run(None)

    @pl.when(i == n_inner - 1)
    def _finalize():
        o_ref[...] = acc_ref[...]          # lane-dense (8,128) partial sums


@jax.jit
def focal_loss(inputs, targets):
    """mean(alpha * (1 - exp(-bce))**gamma * bce) over all elements."""
    n_valid = inputs.size
    if n_valid == 0:
        # torch.mean of an empty tensor is NaN; keep parity, skip the kernel.
        return jnp.float32(jnp.nan)

    x = inputs.reshape(-1)
    t = targets.reshape(-1)

    sub = _sublane_multiple(x.dtype, t.dtype)

    # Lane-dense (rows, 128) layout; rows rounded to the sublane packing so
    # every tile/chunk below stays (8k, 128)-tileable.  The zero pad is skipped
    # for 128*sub-aligned sizes (any multiple of 1024 elements for f32) and its
    # contribution is masked in-kernel, so no sentinel values are relied upon.
    rows = _round_up(_cdiv(n_valid, LANES), sub)
    n_pad = rows * LANES
    if n_pad != n_valid:
        x = jnp.pad(x, (0, n_pad - n_valid))
        t = jnp.pad(t, (0, n_pad - n_valid))
    x = x.reshape(rows, LANES)
    t = t.reshape(rows, LANES)

    # --- Tiling --------------------------------------------------------------
    # P parallel stripes (sharded across TensorCores on multi-core chips) and
    # balanced row tiles: a multiple of CHUNK (or the full array for tiny
    # inputs), capped at TM_MAX rows.
    p_dim = 2 if rows >= 2 * CHUNK else 1
    t0 = max(p_dim, _cdiv(rows, TM_MAX))
    tm = min(rows, _round_up(_cdiv(rows, t0), CHUNK))
    chunk = min(CHUNK, tm)

    n_blocks = _cdiv(rows, tm)                  # real row-blocks
    n_tiles = p_dim * _cdiv(n_blocks, p_dim)    # grid tiles (>= n_blocks)
    n_inner = n_tiles // p_dim
    last_blk = n_blocks - 1
    has_tail = (n_tiles * tm * LANES) != n_valid

    kernel = functools.partial(
        _focal_kernel, n_valid=n_valid, tm=tm, n_inner=n_inner,
        chunk=chunk, has_tail=has_tail)

    def in_map(p, i):
        # Clamp so the (<= P-1) overhang steps keep their DMA in-bounds; the
        # kernel skips their contribution via the element-count check.
        return (jnp.minimum(p * n_inner + i, last_blk), 0)

    partial_sums = pl.pallas_call(
        kernel,
        out_shape=jax.ShapeDtypeStruct((8 * p_dim, LANES), jnp.float32),
        grid_spec=pltpu.PrefetchScalarGridSpec(
            num_scalar_prefetch=0,
            grid=(p_dim, n_inner),
            in_specs=[
                pl.BlockSpec((tm, LANES), in_map),
                pl.BlockSpec((tm, LANES), in_map),
            ],
            out_specs=pl.BlockSpec((8, LANES), lambda p, i: (p, 0)),
            scratch_shapes=[pltpu.VMEM((8, LANES), jnp.float32)],
        ),
        compiler_params=pltpu.CompilerParams(
            dimension_semantics=("parallel", "arbitrary"),
            vmem_limit_bytes=32 * 1024 * 1024,
        ),
    )(x, t)

    # Tiny (P*8, 128) finish plus the hoisted alpha / mean scaling in XLA.
    return jnp.sum(partial_sums) * jnp.float32(ALPHA / n_valid)


if __name__ == "__main__":
    key = jax.random.PRNGKey(0)

    def reference(x, t):
        xf = x.astype(jnp.float32)
        tf = t.astype(jnp.float32)
        bce = jnp.maximum(xf, 0.0) - xf * tf + jnp.log1p(jnp.exp(-jnp.abs(xf)))
        pt = jnp.exp(-bce)
        return jnp.mean(ALPHA * (1.0 - pt) ** GAMMA * bce)

    cases = [
        (2, 4, 16, 16),   # demo shape: 2048 elems, single tile, mask-free path
        (3, 5, 7, 11),    # 1155 elems: exercises the in-kernel ragged-tail mask
        (4, 4, 32, 32),   # 16384 elems: exercises the 2-stripe parallel grid
    ]
    for shape in cases:
        key, k1, k2 = jax.random.split(key, 3)
        x = jax.random.normal(k1, shape, dtype=jnp.float32)
        tgt = (jax.random.uniform(k2, shape) > 0.5).astype(jnp.float32)

        loss = focal_loss(x, tgt)
        jax.block_until_ready(loss)

        ref = reference(x, tgt)
        assert jnp.allclose(loss, ref, rtol=1e-5, atol=1e-6), (shape, loss, ref)

    print("KERNEL_OK")
</pallas_src>

<mosaic_0001>
module attributes {stable_mosaic.version = 11 : i64} {
  func.func @_focal_kernel(%arg0: i32, %arg1: i32, %arg2: memref<16x128xf32, #tpu.memory_space<vmem>>, %arg3: memref<16x128xf32, #tpu.memory_space<vmem>>, %arg4: memref<8x128xf32, #tpu.memory_space<vmem>>, %arg5: memref<8x128xf32, #tpu.memory_space<vmem>>) attributes {dimension_semantics = [#tpu.dimension_semantics<parallel>, #tpu.dimension_semantics<arbitrary>], iteration_bounds = array<i64: 1, 1>, scalar_prefetch = 0 : i64, scratch_operands = 1 : i64, tpu.core_type = #tpu.core_type<tc>, window_params = [{transform_indices = @transform_0, window_bounds = array<i64: 16, 128>}, {transform_indices = @transform_1, window_bounds = array<i64: 16, 128>}, {transform_indices = @transform_2, window_bounds = array<i64: 8, 128>}]} {
    %c0_i32 = arith.constant 0 : i32
    %0 = arith.cmpi eq, %arg1, %c0_i32 : i32
    %1 = arith.extui %0 : i1 to i32
    %c0_i32_0 = arith.constant 0 : i32
    %2 = arith.cmpi ne, %1, %c0_i32_0 : i32
    scf.if %2 {
      %cst_13 = arith.constant 0.000000e+00 : f32
      %34 = vector.broadcast %cst_13 : f32 to vector<8x128xf32>
      %c0_14 = arith.constant 0 : index
      %c0_15 = arith.constant 0 : index
      %35 = vector.load %arg5[%c0_14, %c0_15] : memref<8x128xf32, #tpu.memory_space<vmem>>, vector<8x128xf32>
      tpu.vector_store %arg5[%c0_14, %c0_15], %34 {strides = array<i32>} : memref<8x128xf32, #tpu.memory_space<vmem>>, vector<8x128xf32>,
    } else {
    }
    %c0_i32_1 = arith.constant 0 : i32
    %c16_i32 = arith.constant 16 : i32
    %3 = arith.muli %c0_i32_1, %c16_i32 : i32
    %4 = tpu.assume_multiple %3, 16 : i32
    %5 = arith.index_cast %4 : i32 to index
    %c0 = arith.constant 0 : index
    %6 = vector.load %arg2[%5, %c0] : memref<16x128xf32, #tpu.memory_space<vmem>>, vector<16x128xf32>
    %7 = arith.index_cast %4 : i32 to index
    %c0_2 = arith.constant 0 : index
    %8 = vector.load %arg3[%7, %c0_2] : memref<16x128xf32, #tpu.memory_space<vmem>>, vector<16x128xf32>
    %9 = math.absf %6 : vector<16x128xf32>
    %cst = arith.constant 0.000000e+00 : f32
    %10 = vector.broadcast %cst : f32 to vector<16x128xf32>
    %11 = arith.subf %10, %9 : vector<16x128xf32>
    %12 = math.exp %11 : vector<16x128xf32>
    %cst_3 = arith.constant 0.000000e+00 : f32
    %13 = vector.broadcast %cst_3 : f32 to vector<16x128xf32>
    %14 = arith.maximumf %6, %13 : vector<16x128xf32>
    %15 = arith.mulf %6, %8 : vector<16x128xf32>
    %16 = arith.subf %14, %15 : vector<16x128xf32>
    %17 = math.log1p %12 : vector<16x128xf32>
    %18 = arith.addf %16, %17 : vector<16x128xf32>
    %cst_4 = arith.constant 0.000000e+00 : f32
    %19 = vector.broadcast %cst_4 : f32 to vector<16x128xf32>
    %20 = arith.subf %19, %18 : vector<16x128xf32>
    %21 = math.exp %20 : vector<16x128xf32>
    %cst_5 = arith.constant 1.000000e+00 : f32
    %22 = vector.broadcast %cst_5 : f32 to vector<16x128xf32>
    %23 = arith.subf %22, %21 : vector<16x128xf32>
    %24 = arith.mulf %23, %23 : vector<16x128xf32>
    %25 = arith.mulf %18, %24 : vector<16x128xf32>
    %c0_6 = arith.constant 0 : index
    %c0_7 = arith.constant 0 : index
    %26 = vector.load %arg5[%c0_6, %c0_7] : memref<8x128xf32, #tpu.memory_space<vmem>>, vector<8x128xf32>
    %27 = vector.shape_cast %25 : vector<16x128xf32> to vector<2x8x128xf32>
    %cst_8 = arith.constant dense<0.000000e+00> : vector<8x128xf32>
    %28 = vector.multi_reduction <add>, %27, %cst_8 [0] : vector<2x8x128xf32> to vector<8x128xf32>
    %29 = arith.addf %26, %28 : vector<8x128xf32>
    %c0_9 = arith.constant 0 : index
    %c0_10 = arith.constant 0 : index
    %30 = vector.load %arg5[%c0_9, %c0_10] : memref<8x128xf32, #tpu.memory_space<vmem>>, vector<8x128xf32>
    tpu.vector_store %arg5[%c0_9, %c0_10], %29 {strides = array<i32>} : memref<8x128xf32, #tpu.memory_space<vmem>>, vector<8x128xf32>,
    %c1_i32 = arith.constant 1 : i32
    %c0_i32_11 = arith.constant 0 : i32
    %31 = arith.cmpi eq, %arg1, %c0_i32_11 : i32
    %32 = arith.extui %31 : i1 to i32
    %c0_i32_12 = arith.constant 0 : i32
    %33 = arith.cmpi ne, %32, %c0_i32_12 : i32
    scf.if %33 {
      %c0_13 = arith.constant 0 : index
      %c0_14 = arith.constant 0 : index
      %34 = vector.load %arg5[%c0_13, %c0_14] : memref<8x128xf32, #tpu.memory_space<vmem>>, vector<8x128xf32>
      %c0_15 = arith.constant 0 : index
      %c0_16 = arith.constant 0 : index
      %35 = vector.load %arg4[%c0_15, %c0_16] : memref<8x128xf32, #tpu.memory_space<vmem>>, vector<8x128xf32>
      tpu.vector_store %arg4[%c0_15, %c0_16], %34 {strides = array<i32>} : memref<8x128xf32, #tpu.memory_space<vmem>>, vector<8x128xf32>,
    } else {
    }
    return
  }
  func.func @transform_0(%arg0: i32, %arg1: i32) -> (i32, i32) {
    %c1_i32 = arith.constant 1 : i32
    %0 = arith.muli %arg0, %c1_i32 : i32
    %1 = arith.addi %0, %arg1 : i32
    %c0_i32 = arith.constant 0 : i32
    %2 = arith.minsi %1, %c0_i32 : i32
    %c0_i32_0 = arith.constant 0 : i32
    %c0_i32_1 = arith.constant 0 : i32
    return %2, %c0_i32_0 : i32, i32
  }
  func.func @transform_1(%arg0: i32, %arg1: i32) -> (i32, i32) {
    %c1_i32 = arith.constant 1 : i32
    %0 = arith.muli %arg0, %c1_i32 : i32
    %1 = arith.addi %0, %arg1 : i32
    %c0_i32 = arith.constant 0 : i32
    %2 = arith.minsi %1, %c0_i32 : i32
    %c0_i32_0 = arith.constant 0 : i32
    %c0_i32_1 = arith.constant 0 : i32
    return %2, %c0_i32_0 : i32, i32
  }
  func.func @transform_2(%arg0: i32, %arg1: i32) -> (i32, i32) {
    %c0_i32 = arith.constant 0 : i32
    %c0_i32_0 = arith.constant 0 : i32
    return %arg0, %c0_i32 : i32, i32
  }
}

</mosaic_0001>

<bundles_post_ra>
// kernel: focal_loss.1
= control target key start
LH: loop header
LB: loop body
LE: loop exit
PB: predicated region body
PF: predicated region fallthrough
CT: control target
= control target key end

     0   :  { %s197_s0 = inlined_call_operand.vmem [shape: f32[16,128], index: 0, kind: input, shape index: {}]   ;;  %s198_s1 = inlined_call_operand.vmem [shape: f32[16,128], index: 1, kind: input, shape index: {}]   ;;  %s199_s2 = inlined_call_operand.vmem [shape: f32[8,128], index: 2, kind: output, shape index: {}]  }
   0x1   :  { %v80_v0 = vld [vmem:[%s197_s0] sm:$0xff]  ;;  %v81_v1 = vld [vmem:[%s197_s0 + $0x8] sm:$0xff] }
   0x2   :  { %v84_v2 = vand.u32 2147483647, %v80_v0  ;;  %v85_v3 = vand.u32 2147483647, %v81_v1  ;;  %v82_v14 = vld [vmem:[%s198_s1] sm:$0xff]  ;;  %v83_v15 = vld [vmem:[%s198_s1 + $0x8] sm:$0xff] }
   0x3   :  { %v92_v17 = vmax.f32 %v80_v0, 0.0  ;;  %v94_v18 = vmul.f32 %v82_v14, %v80_v0  ;;  %v93_v21 = vmax.f32 %v81_v1, 0.0  ;;  %v95_v22 = vmul.f32 %v83_v15, %v81_v1 }
   0x4   :  { %v86_v4 = vsub.f32 0.0, %v84_v2  ;;  %v87_v5 = vsub.f32 0.0, %v85_v3 }
   0x5   :  { %v96_v26 = vsub.f32 %v92_v17, %v94_v18  ;;  %v97_v29 = vsub.f32 %v93_v21, %v95_v22 }
   0x6   :  { %v88_v6 = vmul.f32 1.442695, %v86_v4  ;;  %v90_v7 = vmul.f32 1.442695, %v87_v5 }
   0x8   :  { %155 = vpow2.f32 %v88_v6 }
   0x9   :  { %157 = vpow2.f32 %v90_v7 }
  0x12   :  { %v156_v8 = vpop.eup %155 }
  0x13   :  { %v158_v9 = vpop.eup %157  ;;  %v98_v10 = vadd.f32 1.0, %v156_v8  ;;  %v101_v12 = vmul.f32 -0.5, %v156_v8  ;;  %v104_v19 = vand.u32 2147483647, %v156_v8 }
  0x14   :  { %v107_v11 = vadd.f32 1.0, %v158_v9  ;;  %v110_v13 = vmul.f32 -0.5, %v158_v9  ;;  %v113_v23 = vand.u32 2147483647, %v158_v9 }
  0x15   :  { %159 = vlog2.f32 %v98_v10  ;;  %v102_v16 = vadd.f32 1.0, %v101_v12  ;;  %vm105_vm0 = vcmp.lt.f32.partialorder %v104_v19, 0.0004427343 }
  0x16   :  { %161 = vlog2.f32 %v107_v11  ;;  %v111_v20 = vadd.f32 1.0, %v110_v13  ;;  %vm114_vm1 = vcmp.lt.f32.partialorder %v113_v23, 0.0004427343 }
  0x17   :  { %v103_v24 = vmul.f32 %v156_v8, %v102_v16 }
  0x18   :  { %v112_v27 = vmul.f32 %v158_v9, %v111_v20 }
  0x1f   :  { %v160_v25 = vpop.eup %159 }
  0x20   :  { %v162_v28 = vpop.eup %161  ;;  %v100_v30 = vmul.f32 0.6931472, %v160_v25 }
  0x21   :  { %v109_v31 = vmul.f32 0.6931472, %v162_v28 }
  0x22   :  { %v106_v32 = vsel %vm105_vm0, %v103_v24, %v100_v30 }
  0x23   :  { %v115_v33 = vsel %vm114_vm1, %v112_v27, %v109_v31  ;;  %v116_v34 = vadd.f32 %v106_v32, %v96_v26 }
  0x24   :  { %v117_v35 = vadd.f32 %v115_v33, %v97_v29 }
  0x25   :  { %v118_v36 = vsub.f32 0.0, %v116_v34 }
  0x26   :  { %v119_v37 = vsub.f32 0.0, %v117_v35 }
  0x27   :  { %v120_v38 = vmul.f32 1.442695, %v118_v36 }
  0x28   :  { %v122_v39 = vmul.f32 1.442695, %v119_v37 }
  0x29   :  { %163 = vpow2.f32 %v120_v38 }
  0x2a   :  { %165 = vpow2.f32 %v122_v39 }
  0x33   :  { %v164_v40 = vpop.eup %163 }
  0x34   :  { %v166_v41 = vpop.eup %165  ;;  %v124_v42 = vsub.f32 1.0, %v164_v40 }
  0x35   :  { %v125_v43 = vsub.f32 1.0, %v166_v41 }
  0x36   :  { %v126_v44 = vmul.f32 %v124_v42, %v124_v42 }
  0x37   :  { %v127_v45 = vmul.f32 %v125_v43, %v125_v43 }
  0x38   :  { %v128_v46 = vmul.f32 %v126_v44, %v116_v34 }
  0x39   :  { %v129_v47 = vmul.f32 %v127_v45, %v117_v35 }
  0x3b   :  { %v131_v48 = vadd.f32 %v129_v47, %v128_v46 }
  0x3d   :  { %138 = vst [vmem:[%s199_s2] sm:$0xff] %v131_v48 }

</bundles_post_ra>
